<compile_context>
chip_gen: v6e
topology: v6e:2x2x1
jax: 0.10.0
libtpu: 0.0.40
codegen_flags: <defaults>
</compile_context>

<pallas_src>
import functools

import numpy as np
import jax
import jax.numpy as jnp
from jax.experimental import pallas as pl
from jax.experimental.pallas import tpu as pltpu

TAU = 2.0
V_THRESHOLD = 1.0
BN_EPS = 1e-5
_ROW_ALIGN = 16  # bf16 packs 16 rows per sublane-tile; keep row-tile sizes multiples of 16


def _round_up(x, m):
    return (x + m - 1) // m * m


def _conv_tile(xa, xb, w, *, batch, offsets, tile_rows):
    """Fused multi-branch dilated conv on one row tile.

    xa : [tile_rows, Cin] bf16 tile of the padded, flattened input.
    xb : [h, Cin]        bf16 halo block (first h rows of the next tile).
    w  : [len(offsets)*Cin, C] bf16 fused block-sparse weight (C = n_branches * Cout).
    Returns the raw conv accumulator [tile_rows, C] in f32.
    """
    window = jnp.concatenate([xa, xb], axis=0)                      # [tile_rows + h, Cin]
    cols = [window[o * batch: o * batch + tile_rows, :] for o in offsets]
    lhs = jnp.concatenate(cols, axis=-1)                            # [tile_rows, n_off*Cin]
    return jnp.dot(lhs, w, preferred_element_type=jnp.float32)      # single MXU contraction


def _stats_kernel(xa_ref, xb_ref, w_ref, out_ref, *, batch, offsets, tile_rows, n_valid):
    """Pass 1: per-tile per-channel sum / sum-of-squares of the raw conv output."""
    i = pl.program_id(0)
    acc = _conv_tile(xa_ref[...], xb_ref[...], w_ref[...],
                     batch=batch, offsets=offsets, tile_rows=tile_rows)

    def emit(a):
        s = jnp.sum(a, axis=0, keepdims=True)                       # [1, C]
        ss = jnp.sum(a * a, axis=0, keepdims=True)                  # [1, C]
        out_ref[...] = jnp.concatenate([s, ss], axis=0).reshape(1, 2, a.shape[-1])

    @pl.when(i < pl.num_programs(0) - 1)
    def _():                                                        # fully-valid tiles: no mask
        emit(acc)

    @pl.when(i == pl.num_programs(0) - 1)
    def _():                                                        # last tile: mask pad rows
        row = jax.lax.broadcasted_iota(jnp.int32, acc.shape, 0) + i * tile_rows
        emit(jnp.where(row < n_valid, acc, 0.0))


def _apply_kernel(xa_ref, xb_ref, w_ref, scale_ref, shift_ref, out_ref, *,
                  batch, offsets, tile_rows, v_threshold):
    """Pass 2: recompute conv tile, apply folded BN-affine + LIF threshold, emit bf16 spikes."""
    acc = _conv_tile(xa_ref[...], xb_ref[...], w_ref[...],
                     batch=batch, offsets=offsets, tile_rows=tile_rows)
    v = acc * scale_ref[...] + shift_ref[...]                       # membrane potential y/tau (f32)
    out_ref[...] = (v >= v_threshold).astype(out_ref.dtype)


def local_spiking_feature(x, params, kernel_sizes=(3, 5, 7), dilations=(1, 2, 3),
                          block_rows=4096, out_dtype=jnp.bfloat16):
    """x: [T, B, Cin] float. Returns [T, B, len(kernel_sizes)*Cout] spikes (exact 0/1, bf16)."""
    T, B, Cin = x.shape
    R = T * B
    Cout = params[0][0].shape[-1]
    n_branch = len(kernel_sizes)
    C = n_branch * Cout

    pads = [(k - 1) * d // 2 for k, d in zip(kernel_sizes, dilations)]
    pad_max = max(pads)

    # Tap offsets in units of B rows of the flattened [T*B] layout: branch i, tap j reads
    # padded row r + (pad_max - pad_i + j*d_i)*B for output row r.
    branch_offsets = [[pad_max - p + j * d for j in range(k)]
                      for k, d, p in zip(kernel_sizes, dilations, pads)]
    offsets = tuple(sorted({o for offs in branch_offsets for o in offs}))
    off_index = {o: idx for idx, o in enumerate(offsets)}

    # Fused block-sparse weight [n_off*Cin, C] in bf16 (MXU operand); zeros where a branch
    # has no tap at an offset. Conv1d bias dropped (exact no-op under training-mode BN).
    w_fused = jnp.zeros((len(offsets) * Cin, C), jnp.float32)
    for bi, ((w, _b, _g, _bt), offs) in enumerate(zip(params, branch_offsets)):
        for j, o in enumerate(offs):
            oi = off_index[o]
            w_fused = w_fused.at[oi * Cin:(oi + 1) * Cin,
                                 bi * Cout:(bi + 1) * Cout].set(w[j].astype(jnp.float32))
    w_fused = w_fused.astype(jnp.bfloat16)

    # ---- row tiling ------------------------------------------------------------------------
    halo = 2 * pad_max * B                                          # halo rows a tile reads past its end
    min_tile = max(_round_up(halo, _ROW_ALIGN), _ROW_ALIGN)
    half = _round_up(-(-R // 2), _ROW_ALIGN)                        # keep >=2 tiles (v7x dual-TC)
    tile_rows = max(min(block_rows, half), min_tile)
    tile_rows = _round_up(tile_rows, _ROW_ALIGN)
    num_tiles = pl.cdiv(R, tile_rows)

    # Halo block: smallest aligned row count >= halo that divides tile_rows, so the halo can
    # be addressed as block index (i+1)*ratio of the SAME padded array (no duplicate big DMA).
    h = _round_up(max(halo, _ROW_ALIGN), _ROW_ALIGN)
    while tile_rows % h:
        h += _ROW_ALIGN
    ratio = tile_rows // h

    total_rows = num_tiles * tile_rows + h
    pad_front = pad_max * B
    pad_back = total_rows - R - pad_front

    # bf16 input streaming: halves input DMA bytes and the vregs the im2col shuffle moves;
    # the cast fuses into the (already required) single zero-pad copy.
    x_flat = x.reshape(R, Cin).astype(jnp.bfloat16)                 # free reshape of [T, B, Cin]
    xp = jnp.pad(x_flat, ((pad_front, pad_back), (0, 0)))

    x_spec_lo = pl.BlockSpec((tile_rows, Cin), lambda i: (i, 0))
    x_spec_hi = pl.BlockSpec((h, Cin), lambda i: ((i + 1) * ratio, 0))   # small halo block
    w_spec = pl.BlockSpec(w_fused.shape, lambda i: (0, 0))
    # 32 MiB scoped VMEM is safe on every generation (v7x physical = 64 MiB) and covers the
    # lane-padded footprint of 4K-row tiles with Cin=4 / C=24.
    cparams = pltpu.CompilerParams(dimension_semantics=("parallel",),
                                   vmem_limit_bytes=32 * 1024 * 1024)

    # ---- pass 1: per-tile partial BN statistics (sum, sumsq) -------------------------------
    stats = pl.pallas_call(
        functools.partial(_stats_kernel, batch=B, offsets=offsets,
                          tile_rows=tile_rows, n_valid=R),
        out_shape=jax.ShapeDtypeStruct((num_tiles, 2, C), jnp.float32),
        grid=(num_tiles,),
        in_specs=[x_spec_lo, x_spec_hi, w_spec],
        out_specs=pl.BlockSpec((1, 2, C), lambda i: (i, 0, 0)),
        compiler_params=cparams,
    )(xp, xp, w_fused)

    # Tiny reduction + fold BN affine and LIF 1/tau into per-channel scale/shift (XLA side).
    # NOTE: E[x^2]-E[x]^2 in f32 can cancel when |mean| >> std; guarded with max(.,0).
    mean = jnp.sum(stats[:, 0, :], axis=0) / R
    var = jnp.maximum(jnp.sum(stats[:, 1, :], axis=0) / R - mean * mean, 0.0)   # biased var
    gamma = jnp.concatenate([g for (_w, _b, g, _bt) in params]).astype(jnp.float32)
    beta = jnp.concatenate([bt for (_w, _b, _g, bt) in params]).astype(jnp.float32)
    inv_std = jax.lax.rsqrt(var + BN_EPS)
    scale = (gamma * inv_std / TAU).reshape(1, C)
    shift = ((beta - gamma * mean * inv_std) / TAU).reshape(1, C)

    # ---- pass 2: conv + folded BN/LIF threshold -> bf16 spikes ------------------------------
    # Exact-R output (Pallas clips the partial last block) => no wrapper-side [:R] copy.
    # Degenerate tiny-input case (single tile larger than R): pad + slice, cost negligible.
    out_rows = R if R >= tile_rows else num_tiles * tile_rows
    spikes = pl.pallas_call(
        functools.partial(_apply_kernel, batch=B, offsets=offsets,
                          tile_rows=tile_rows, v_threshold=V_THRESHOLD),
        out_shape=jax.ShapeDtypeStruct((out_rows, C), out_dtype),
        grid=(num_tiles,),
        in_specs=[x_spec_lo, x_spec_hi, w_spec,
                  pl.BlockSpec((1, C), lambda i: (0, 0)),
                  pl.BlockSpec((1, C), lambda i: (0, 0))],
        out_specs=pl.BlockSpec((tile_rows, C), lambda i: (i, 0)),
        compiler_params=cparams,
    )(xp, xp, w_fused, scale, shift)

    if out_rows != R:
        spikes = spikes[:R]
    return spikes.reshape(T, B, C)


def init_params(key, in_channels, out_channels, kernel_sizes=(3, 5, 7)):
    """Deterministic synthetic init mirroring nn.Conv1d + nn.BatchNorm1d shapes."""
    params = []
    for i, k in enumerate(kernel_sizes):
        kw, kb = jax.random.split(jax.random.fold_in(key, i))
        fan_in = in_channels * k
        bound = 1.0 / (fan_in ** 0.5)
        # PyTorch Conv1d weight layout is [Cout, Cin, k]; kernels consume [k, Cin, Cout].
        w_pt = jax.random.uniform(kw, (out_channels, in_channels, k),
                                  jnp.float32, -bound, bound)
        w = jnp.transpose(w_pt, (2, 1, 0))
        b = jax.random.uniform(kb, (out_channels,), jnp.float32, -bound, bound)
        gamma = jnp.ones((out_channels,), jnp.float32)
        beta = jnp.zeros((out_channels,), jnp.float32)
        params.append((w, b, gamma, beta))
    return params


def _reference_membrane(x, params, kernel_sizes=(3, 5, 7), dilations=(1, 2, 3)):
    """Pure-JAX reference: Conv1d + training-mode BN + LIF membrane v (pre-threshold).

    Uses bf16-rounded inputs/weights (the kernel's MXU operand precision) with f32
    accumulation, so remaining differences are only summation order.
    """
    T = x.shape[0]
    xb = jnp.transpose(x, (1, 2, 0)).astype(jnp.bfloat16).astype(jnp.float32)   # [B, Cin, T]
    vs = []
    for (k, d), (w, b, gamma, beta) in zip(zip(kernel_sizes, dilations), params):
        p = (k - 1) * d // 2
        w32 = w.astype(jnp.bfloat16).astype(jnp.float32)
        xpad = jnp.pad(xb, ((0, 0), (0, 0), (p, p)))
        acc = jnp.zeros((xb.shape[0], w.shape[2], T), jnp.float32)
        for j in range(k):
            xs = xpad[:, :, j * d: j * d + T]
            acc = acc + jnp.einsum('bct,co->bot', xs, w32[j],
                                   precision=jax.lax.Precision.HIGHEST)
        acc = acc + b[None, :, None].astype(jnp.float32)            # cancels through BN
        mean = jnp.mean(acc, axis=(0, 2), keepdims=True)
        var = jnp.mean((acc - mean) ** 2, axis=(0, 2), keepdims=True)
        y = (acc - mean) * jax.lax.rsqrt(var + BN_EPS) * gamma[None, :, None] + beta[None, :, None]
        vs.append(y / TAU)
    return jnp.transpose(jnp.concatenate(vs, axis=1), (2, 0, 1))    # [T, B, 3*Cout]


if __name__ == "__main__":
    key = jax.random.PRNGKey(0)
    Cin, Cout = 4, 8
    # Small case matches the module's typical tiny test; the larger case exercises multiple
    # tiles, the small-halo BlockSpec (ratio > 1), last-tile masking and output clipping.
    for (T, B) in [(8, 2), (500, 2)]:
        kx, kp = jax.random.split(jax.random.fold_in(key, T))
        x = jax.random.normal(kx, (T, B, Cin), dtype=jnp.float32)   # [T, B, Cin]
        params = init_params(kp, Cin, Cout)

        out = local_spiking_feature(x, params)
        jax.block_until_ready(out)
        assert out.shape == (T, B, 3 * Cout), out.shape

        # Correctness vs. pure-JAX reference; tolerate flips only where the membrane
        # potential sits within a tiny margin of the threshold (fp summation-order).
        v_ref = _reference_membrane(x, params)
        spikes_ref = (v_ref >= V_THRESHOLD).astype(jnp.float32)
        out_np = np.asarray(out.astype(jnp.float32))
        ref_np = np.asarray(spikes_ref)
        near = np.abs(np.asarray(v_ref) - V_THRESHOLD) < 1e-2
        mismatch = out_np != ref_np
        assert np.all(~mismatch | near), f"T={T}: {int(mismatch.sum())} spike mismatches"
    print("KERNEL_OK")
</pallas_src>

<mosaic_0001>
module attributes {stable_mosaic.version = 11 : i64} {
  func.func @_stats_kernel(%arg0: i32, %arg1: memref<48x4xbf16, #tpu.memory_space<vmem>>, %arg2: memref<48x4xbf16, #tpu.memory_space<vmem>>, %arg3: memref<52x24xbf16, #tpu.memory_space<vmem>>, %arg4: memref<1x2x24xf32, #tpu.memory_space<vmem>>) attributes {dimension_semantics = [#tpu.dimension_semantics<parallel>], iteration_bounds = array<i64: 1>, scalar_prefetch = 0 : i64, scratch_operands = 0 : i64, tpu.core_type = #tpu.core_type<tc>, window_params = [{transform_indices = @transform_0, window_bounds = array<i64: 48, 4>}, {transform_indices = @transform_1, window_bounds = array<i64: 48, 4>}, {pipeline_mode = #tpu.pipeline_mode<synchronous>, transform_indices = @transform_2, window_bounds = array<i64: 52, 24>}, {transform_indices = @transform_3, window_bounds = array<i64: 1, 2, 24>}]} {
    %c0 = arith.constant 0 : index
    %c0_0 = arith.constant 0 : index
    %0 = vector.load %arg1[%c0, %c0_0] : memref<48x4xbf16, #tpu.memory_space<vmem>>, vector<48x4xbf16>
    %c0_1 = arith.constant 0 : index
    %c0_2 = arith.constant 0 : index
    %1 = vector.load %arg2[%c0_1, %c0_2] : memref<48x4xbf16, #tpu.memory_space<vmem>>, vector<48x4xbf16>
    %c0_3 = arith.constant 0 : index
    %c0_4 = arith.constant 0 : index
    %2 = vector.load %arg3[%c0_3, %c0_4] : memref<52x24xbf16, #tpu.memory_space<vmem>>, vector<52x24xbf16>
    %3 = tpu.concatenate %0, %1 in 0 : vector<48x4xbf16>, vector<48x4xbf16> -> vector<96x4xbf16>
    %4 = vector.extract_strided_slice %3 {offsets = [0, 0], sizes = [48, 4], strides = [1, 1]} : vector<96x4xbf16> to vector<48x4xbf16>
    %5 = vector.extract_strided_slice %3 {offsets = [6, 0], sizes = [48, 4], strides = [1, 1]} : vector<96x4xbf16> to vector<48x4xbf16>
    %6 = vector.extract_strided_slice %3 {offsets = [10, 0], sizes = [48, 4], strides = [1, 1]} : vector<96x4xbf16> to vector<48x4xbf16>
    %7 = vector.extract_strided_slice %3 {offsets = [12, 0], sizes = [48, 4], strides = [1, 1]} : vector<96x4xbf16> to vector<48x4xbf16>
    %8 = vector.extract_strided_slice %3 {offsets = [14, 0], sizes = [48, 4], strides = [1, 1]} : vector<96x4xbf16> to vector<48x4xbf16>
    %9 = vector.extract_strided_slice %3 {offsets = [16, 0], sizes = [48, 4], strides = [1, 1]} : vector<96x4xbf16> to vector<48x4xbf16>
    %10 = vector.extract_strided_slice %3 {offsets = [18, 0], sizes = [48, 4], strides = [1, 1]} : vector<96x4xbf16> to vector<48x4xbf16>
    %11 = vector.extract_strided_slice %3 {offsets = [20, 0], sizes = [48, 4], strides = [1, 1]} : vector<96x4xbf16> to vector<48x4xbf16>
    %12 = vector.extract_strided_slice %3 {offsets = [22, 0], sizes = [48, 4], strides = [1, 1]} : vector<96x4xbf16> to vector<48x4xbf16>
    %13 = vector.extract_strided_slice %3 {offsets = [24, 0], sizes = [48, 4], strides = [1, 1]} : vector<96x4xbf16> to vector<48x4xbf16>
    %14 = vector.extract_strided_slice %3 {offsets = [26, 0], sizes = [48, 4], strides = [1, 1]} : vector<96x4xbf16> to vector<48x4xbf16>
    %15 = vector.extract_strided_slice %3 {offsets = [30, 0], sizes = [48, 4], strides = [1, 1]} : vector<96x4xbf16> to vector<48x4xbf16>
    %16 = vector.extract_strided_slice %3 {offsets = [36, 0], sizes = [48, 4], strides = [1, 1]} : vector<96x4xbf16> to vector<48x4xbf16>
    %17 = tpu.concatenate %4, %5, %6, %7, %8, %9, %10, %11, %12, %13, %14, %15, %16 in 1 : vector<48x4xbf16>, vector<48x4xbf16>, vector<48x4xbf16>, vector<48x4xbf16>, vector<48x4xbf16>, vector<48x4xbf16>, vector<48x4xbf16>, vector<48x4xbf16>, vector<48x4xbf16>, vector<48x4xbf16>, vector<48x4xbf16>, vector<48x4xbf16>, vector<48x4xbf16> -> vector<48x52xbf16>
    %cst = arith.constant dense<0.000000e+00> : vector<48x24xf32>
    %18 = tpu.matmul %17, %2, %cst {dimension_numbers = #tpu.dot_dimension_numbers<[1], [0], [0], [1], [0, 0, 1, 1], [], []>} : vector<48x52xbf16>, vector<52x24xbf16>, vector<48x24xf32> -> vector<48x24xf32>
    %c0_i32 = arith.constant 0 : i32
    %19 = arith.cmpi slt, %arg0, %c0_i32 : i32
    %20 = arith.extui %19 : i1 to i32
    %c0_i32_5 = arith.constant 0 : i32
    %21 = arith.cmpi ne, %20, %c0_i32_5 : i32
    scf.if %21 {
      %cst_8 = arith.constant dense<0.000000e+00> : vector<24xf32>
      %25 = vector.multi_reduction <add>, %18, %cst_8 [0] : vector<48x24xf32> to vector<24xf32>
      %26 = vector.shape_cast %25 : vector<24xf32> to vector<1x24xf32>
      %27 = arith.mulf %18, %18 : vector<48x24xf32>
      %cst_9 = arith.constant dense<0.000000e+00> : vector<24xf32>
      %28 = vector.multi_reduction <add>, %27, %cst_9 [0] : vector<48x24xf32> to vector<24xf32>
      %29 = vector.shape_cast %28 : vector<24xf32> to vector<1x24xf32>
      %30 = tpu.concatenate %26, %29 in 0 : vector<1x24xf32>, vector<1x24xf32> -> vector<2x24xf32>
      %31 = vector.shape_cast %30 : vector<2x24xf32> to vector<1x2x24xf32>
      %c0_10 = arith.constant 0 : index
      %c0_11 = arith.constant 0 : index
      %c0_12 = arith.constant 0 : index
      %32 = vector.load %arg4[%c0_10, %c0_11, %c0_12] : memref<1x2x24xf32, #tpu.memory_space<vmem>>, vector<1x2x24xf32>
      tpu.vector_store %arg4[%c0_10, %c0_11, %c0_12], %31 {strides = array<i32>} : memref<1x2x24xf32, #tpu.memory_space<vmem>>, vector<1x2x24xf32>,
    } else {
    }
    %c0_i32_6 = arith.constant 0 : i32
    %22 = arith.cmpi eq, %arg0, %c0_i32_6 : i32
    %23 = arith.extui %22 : i1 to i32
    %c0_i32_7 = arith.constant 0 : i32
    %24 = arith.cmpi ne, %23, %c0_i32_7 : i32
    scf.if %24 {
      %25 = tpu.iota {dimensions = array<i32: 0>} : vector<48x24xi32>
      %c48_i32 = arith.constant 48 : i32
      %26 = arith.muli %arg0, %c48_i32 : i32
      %27 = vector.broadcast %26 : i32 to vector<48x24xi32>
      %28 = arith.addi %25, %27 : vector<48x24xi32>
      %c16_i32 = arith.constant 16 : i32
      %29 = vector.broadcast %c16_i32 : i32 to vector<48x24xi32>
      %30 = arith.cmpi slt, %28, %29 : vector<48x24xi32>
      %cst_8 = arith.constant 0.000000e+00 : f32
      %31 = vector.broadcast %cst_8 : f32 to vector<48x24xf32>
      %32 = arith.select %30, %18, %31 : vector<48x24xi1>, vector<48x24xf32>
      %cst_9 = arith.constant dense<0.000000e+00> : vector<24xf32>
      %33 = vector.multi_reduction <add>, %32, %cst_9 [0] : vector<48x24xf32> to vector<24xf32>
      %34 = vector.shape_cast %33 : vector<24xf32> to vector<1x24xf32>
      %35 = arith.mulf %32, %32 : vector<48x24xf32>
      %cst_10 = arith.constant dense<0.000000e+00> : vector<24xf32>
      %36 = vector.multi_reduction <add>, %35, %cst_10 [0] : vector<48x24xf32> to vector<24xf32>
      %37 = vector.shape_cast %36 : vector<24xf32> to vector<1x24xf32>
      %38 = tpu.concatenate %34, %37 in 0 : vector<1x24xf32>, vector<1x24xf32> -> vector<2x24xf32>
      %39 = vector.shape_cast %38 : vector<2x24xf32> to vector<1x2x24xf32>
      %c0_11 = arith.constant 0 : index
      %c0_12 = arith.constant 0 : index
      %c0_13 = arith.constant 0 : index
      %40 = vector.load %arg4[%c0_11, %c0_12, %c0_13] : memref<1x2x24xf32, #tpu.memory_space<vmem>>, vector<1x2x24xf32>
      tpu.vector_store %arg4[%c0_11, %c0_12, %c0_13], %39 {strides = array<i32>} : memref<1x2x24xf32, #tpu.memory_space<vmem>>, vector<1x2x24xf32>,
    } else {
    }
    return
  }
  func.func @transform_0(%arg0: i32) -> (i32, i32) {
    %c0_i32 = arith.constant 0 : i32
    %c0_i32_0 = arith.constant 0 : i32
    return %arg0, %c0_i32 : i32, i32
  }
  func.func @transform_1(%arg0: i32) -> (i32, i32) {
    %c1_i32 = arith.constant 1 : i32
    %0 = arith.addi %arg0, %c1_i32 : i32
    %c1_i32_0 = arith.constant 1 : i32
    %1 = arith.muli %0, %c1_i32_0 : i32
    %c0_i32 = arith.constant 0 : i32
    %c0_i32_1 = arith.constant 0 : i32
    return %1, %c0_i32 : i32, i32
  }
  func.func @transform_2(%arg0: i32) -> (i32, i32) {
    %c0_i32 = arith.constant 0 : i32
    %c0_i32_0 = arith.constant 0 : i32
    %c0_i32_1 = arith.constant 0 : i32
    return %c0_i32, %c0_i32_0 : i32, i32
  }
  func.func @transform_3(%arg0: i32) -> (i32, i32, i32) {
    %c0_i32 = arith.constant 0 : i32
    %c0_i32_0 = arith.constant 0 : i32
    %c0_i32_1 = arith.constant 0 : i32
    return %arg0, %c0_i32, %c0_i32_0 : i32, i32, i32
  }
}

</mosaic_0001>

<bundles_post_ra>
// kernel: tpu_custom_call.1
= control target key start
LH: loop header
LB: loop body
LE: loop exit
PB: predicated region body
PF: predicated region fallthrough
CT: control target
= control target key end

     0   :  { %vm115_vm0 = vcmask 1041408   ;;  %vm87_vm1 = vcmask 1044480   ;;  %vm129_vm2 = vcmask 1040384   ;;  %vm101_vm3 = vcmask 1042432   ;;  %s643_s18 = smov 12   ;;  %s644_s19 = smov 4   ;;  %s890_s0 = inlined_call_operand.vmem [shape: bf16[96,4], index: 0, kind: input, shape index: {}]   ;;  %s891_s1 = inlined_call_operand.vmem [shape: bf16[96,4], index: 1, kind: input, shape index: {}]   ;;  %s892_s2 = inlined_call_operand.vmem [shape: bf16[52,24], index: 2, kind: input, shape index: {}]   ;;  %s893_s3 = inlined_call_operand.hbm [shape: f32[1,2,24], index: 3, kind: output, shape index: {}]  }
   0x1   :  { %v681_v0 = vld [vmem:[%s890_s0] sm:$0xff]   ;;  %v686_v1 = vld [vmem:[%s890_s0 + $0x8] sm:$0xff]   ;;  %v695_v6 = vld [vmem:[%s890_s0 + $0x10] sm:$0xff]   ;;  %vm149_vm4 = vcmask 1046528   ;;  %s645_s0 = smov 16   ;;  %s646_s20 = smov 8  }
   0x2   :  { %v116_v2 = vrot.slane %v681_v0, 6  ;;  %v117_v3 = vrot.slane %v686_v1, 6  ;;  %v88_v4 = vrot.slane %v681_v0, 3  ;;  %v89_v5 = vrot.slane %v686_v1, 3  ;;  %s647_s21 = smov 24   ;;  %s648_s22 = smov 20  }
   0x3   :  { %v130_v7 = vrot.slane %v681_v0, 7  ;;  %v131_v8 = vrot.slane %v686_v1, 7  ;;  %v102_v9 = vrot.slane %v681_v0, 5  ;;  %v103_v10 = vrot.slane %v686_v1, 5 }
   0x4   :  { %v118_v11 = vsel %vm115_vm0, %v116_v2, %v117_v3  ;;  %v90_v12 = vsel %vm87_vm1, %v88_v4, %v89_v5  ;;  %v150_v15 = vrot.slane %v686_v1, 1  ;;  %v151_v16 = vrot.slane %v695_v6, 1  ;;  %v617_v26 = vld [vmem:[%s892_s2 + $0x18] ss:$0 sps:$4 sm:$0x33]  }
   0x5   :  { %123 = vrot.lane.b32.xlu1 %v118_v11, %s643_s18  ;;  %95 = vrot.lane.b32.xlu0 %v90_v12, %s644_s19  ;;  %v132_v13 = vsel %vm129_vm2, %v130_v7, %v131_v8  ;;  %v104_v14 = vsel %vm101_vm3, %v102_v9, %v103_v10  ;;  %v91_v17 = vrot.slane %v695_v6, 3  ;;  %v164_v19 = vrot.slane %v686_v1, 2 }
   0x6   :  { %v152_v18 = vsel %vm149_vm4, %v150_v15, %v151_v16  ;;  %v165_v20 = vrot.slane %v695_v6, 2  ;;  %vm163_vm5 = vcmask 1045504   ;;  %v105_v21 = vrot.slane %v695_v6, 5 }
   0x7   :  { %vm185_vm6 = vcmask 1043456   ;;  %v186_v22 = vrot.slane %v686_v1, 4  ;;  %v92_v23 = vsel %vm87_vm1, %v89_v5, %v91_v17  ;;  %v187_v25 = vrot.slane %v695_v6, 4 }
   0x8   :  { %v166_v24 = vsel %vm163_vm5, %v164_v19, %v165_v20 }
   0x9   :  { %137 = vrot.lane.b32.xlu1 %v132_v13, %s645_s0  ;;  %109 = vrot.lane.b32.xlu0 %v104_v14, %s646_s20 }
   0xd   :  { %157 = vrot.lane.b32.xlu1 %v152_v18, %s647_s21  ;;  %143 = vrot.lane.b32.xlu0 %v686_v1, %s648_s22 }
   0xe   :  { %8 = vsyncpa [#allocation3], 0  ;;  %s649_s25 = smov 32   ;;  %s650_s26 = smov 28   ;;  %v106_v27 = vsel %vm101_vm3, %v103_v10, %v105_v21  ;;  %v188_v28 = vsel %vm185_vm6, %v186_v22, %v187_v25  ;;  %v133_v29 = vrot.slane %v695_v6, 7  ;;  %v742_v30 = vld [vmem:[%s891_s1 + $0x18] sm:$0xff]  }
   0xf   :  { %v340_v31 = vsel %vm115_vm0, %v617_v26, 0  ;;  %v651_v32 = vmov 0.0   ;;  %v618_v33 = vld [vmem:[%s892_s2 + $0x10] sm:$0xff]   ;;  %s652_s4 = smov 40   ;;  %s653_s5 = smov 36   ;;  %v167_v35 = vrot.slane %v742_v30, 2 }
  0x10   :  { %568 = vmatprep.subr.bf16.mxu0 %v651_v32  ;;  %588 = vmatprep.subr.bf16.mxu1 %v651_v32  ;;  %v134_v34 = vsel %vm129_vm2, %v131_v8, %v133_v29  ;;  %vm654_vm7 = vmmov 0   ;;  %v619_v36 = vld [vmem:[%s892_s2 + $0x8] sm:$0xff]   ;;  %s655_s8 = smov 44   ;;  %v119_v38 = vrot.slane %v695_v6, 6  ;;  %v620_v39 = vld [vmem:[%s892_s2] sm:$0xff]   ;;  %s656_s11 = smov 48  }
  0x11   :  { %179 = vrot.lane.b32.xlu1 %v92_v23, %s649_s25  ;;  %171 = vrot.lane.b32.xlu0 %v166_v24, %s650_s26  ;;  %v168_v37 = vsel %vm163_vm5, %v165_v20, %v167_v35  ;;  %v153_v41 = vrot.slane %v742_v30, 1  ;;  %v93_v43 = vrot.slane %v742_v30, 3  ;;  %v189_v45 = vrot.slane %v742_v30, 4  ;;  %v615_v51 = vld [vmem:[%s891_s1 + $0x20] sm:$0xff]   ;;  %v616_v62 = vld [vmem:[%s891_s1 + $0x28] sm:$0xff]   ;;  %s657_s1 = smov [#allocation2]  }
  0x12   :  { %569 = vmatpush3.bf16.msra.mxu0 %v340_v31  ;;  %592 = vmatpush3.bf16.msra.mxu1 %v340_v31  ;;  %v120_v40 = vsel %vm115_vm0, %v117_v3, %v119_v38  ;;  %v107_v47 = vrot.slane %v742_v30, 5  ;;  %v135_v49 = vrot.slane %v742_v30, 7  ;;  %v121_v50 = vrot.slane %v742_v30, 6  ;;  %s528_s15 = sshll.u32 %s657_s1, 4  ;;  %s529_s15 = int_to_ptr.vmem [resolvable:$true] %s528_s15 }
  0x13   :  { %570 = vmatprep.subr.bf16.mxu0 %v651_v32  ;;  %576 = vmatprep.mubr.msk.bf16.mxu0 %vm654_vm7, %v651_v32  ;;  %v154_v42 = vsel %vm149_vm4, %v151_v16, %v153_v41  ;;  %v94_v44 = vsel %vm87_vm1, %v91_v17, %v93_v43  ;;  %v190_v46 = vsel %vm185_vm6, %v187_v25, %v189_v45  ;;  %v169_v54 = vrot.slane %v615_v51, 2  ;;  %s621_s16 = scalar_lea.vmem %s529_s15, 32  ;;  %p626_p1 = scmp.lt.s32.totalorder %s529_s15, %s529_s15 }
  0x14   :  { %589 = vmatprep.subr.bf16.mxu1 %v651_v32  ;;  %580 = vmatprep.mubr.msk.bf16.mxu1 %vm654_vm7, %v651_v32  ;;  %v108_v48 = vsel %vm101_vm3, %v105_v21, %v107_v47  ;;  %v136_v52 = vsel %vm129_vm2, %v133_v29, %v135_v49  ;;  %v122_v53 = vsel %vm115_vm0, %v119_v38, %v121_v50  ;;  %v155_v56 = vrot.slane %v615_v51, 1  ;;  %p622_p0 = scmp.ne.s32.totalorder %s529_s15, %s621_s16  ;;  %p627_p2 = scmp.lt.s32.totalorder %s621_s16, %s621_s16 }
  0x15   :  { %201 = vrot.lane.b32.xlu1 %v106_v27, %s652_s4  ;;  %193 = vrot.lane.b32.xlu0 %v188_v28, %s653_s5  ;;  %v170_v55 = vsel %vm163_vm5, %v167_v35, %v169_v54  ;;  %v177_v58 = vrot.slane %v615_v51, 3  ;;  %v191_v60 = vrot.slane %v615_v51, 4  ;;  %v199_v61 = vrot.slane %v615_v51, 5 }
  0x16   :  { %571 = vmatpush3.bf16.msra.mxu0 %v618_v33  ;;  %593 = vmatpush3.bf16.msra.mxu1 %v618_v33  ;;  %v156_v57 = vsel %vm149_vm4, %v153_v41, %v155_v56  ;;  %v207_v3 = vrot.slane %v615_v51, 7  ;;  %v215_v4 = vrot.slane %v616_v62, 2  ;;  %vm223_vm8 = vcmask 31744   ;;  %p628_p3 = por %p627_p2, %p626_p1 }
  0x17   :  { %572 = vmatprep.subr.bf16.mxu0 %v651_v32  ;;  %590 = vmatprep.subr.bf16.mxu1 %v651_v32  ;;  %v178_v59 = vsel %vm87_vm1, %v93_v43, %v177_v58  ;;  %v192_v63 = vsel %vm185_vm6, %v189_v45, %v191_v60  ;;  %v200_v2 = vsel %vm101_vm3, %v107_v47, %v199_v61  ;;  %vm233_vm9 = vcmask 64512  }
  0x18   :  { %v208_v5 = vsel %vm129_vm2, %v135_v49, %v207_v3  ;;  %v216_v7 = vsel %vm163_vm5, %v169_v54, %v215_v4  ;;  %vm240_vm10 = vcmask 97280   ;;  %vm247_vm11 = vcmask 130048   ;;  %p629_p4 = pnand %p628_p3, %p622_p0 }
  0x19   :  { %209 = vrot.lane.b32.xlu1 %v134_v34, %s655_s8  ;;  %97 = vrot.lane.b32.xlu0 %v92_v23, %s644_s19  ;;  %vm254_vm12 = vcmask 162816   ;;  %vm261_vm13 = vcmask 195584   ;;  %vm268_vm14 = vcmask 228352   ;;  %vm275_vm15 = vcmask 261120  }
  0x1a   :  { %573 = vmatpush3.bf16.msra.mxu0 %v619_v36  ;;  %594 = vmatpush3.bf16.msra.mxu1 %v619_v36  ;;  %vm282_vm0 = vcmask 293888   ;;  %vm289_vm1 = vcmask 326656   ;;  %vm296_vm3 = vcmask 359424   ;;  %vm303_vm4 = vcmask 392192  }
  0x1b   :  { %574 = vmatprep.subr.bf16.mxu0 %v651_v32  ;;  %591 = vmatprep.subr.bf16.mxu1 %v651_v32  ;;  %vm331_vm5 = vcmask 424960   ;;  %vm520_vm6 = vcmask 189440  }
  0x1d   :  { %217 = vrot.lane.b32.xlu1 %v168_v37, %s656_s11  ;;  %111 = vrot.lane.b32.xlu0 %v106_v27, %s646_s20 }
  0x1e   :  { %575 = vmatpush3.bf16.msra.mxu0 %v620_v39  ;;  %595 = vmatpush3.bf16.msra.mxu1 %v620_v39 }
  0x21   :  { %139 = vrot.lane.b32.xlu1 %v134_v34, %s645_s0  ;;  %125 = vrot.lane.b32.xlu0 %v120_v40, %s643_s18 }
  0x25   :  { %159 = vrot.lane.b32.xlu1 %v154_v42, %s647_s21  ;;  %145 = vrot.lane.b32.xlu0 %v695_v6, %s648_s22 }
  0x29   :  { %181 = vrot.lane.b32.xlu1 %v94_v44, %s649_s25  ;;  %173 = vrot.lane.b32.xlu0 %v168_v37, %s650_s26 }
  0x2d   :  { %195 = vrot.lane.b32.xlu1 %v190_v46, %s653_s5  ;;  %99 = vrot.lane.b32.xlu0 %v94_v44, %s644_s19 }
  0x31   :  { %203 = vrot.lane.b32.xlu1 %v108_v48, %s652_s4  ;;  %113 = vrot.lane.b32.xlu0 %v108_v48, %s646_s20 }
  0x35   :  { %211 = vrot.lane.b32.xlu1 %v136_v52, %s655_s8  ;;  %127 = vrot.lane.b32.xlu0 %v122_v53, %s643_s18 }
  0x39   :  { %219 = vrot.lane.b32.xlu1 %v170_v55, %s656_s11  ;;  %141 = vrot.lane.b32.xlu0 %v136_v52, %s645_s0 }
  0x3d   :  { %147 = vrot.lane.b32.xlu0 %v742_v30, %s648_s22  ;;  %161 = vrot.lane.b32.xlu1 %v156_v57, %s647_s21 }
  0x41   :  { %175 = vrot.lane.b32.xlu0 %v170_v55, %s650_s26  ;;  %183 = vrot.lane.b32.xlu1 %v178_v59, %s649_s25 }
  0x45   :  { %197 = vrot.lane.b32.xlu0 %v192_v63, %s653_s5  ;;  %205 = vrot.lane.b32.xlu1 %v200_v2, %s652_s4 }
  0x49   :  { %213 = vrot.lane.b32.xlu0 %v208_v5, %s655_s8  ;;  %221 = vrot.lane.b32.xlu1 %v216_v7, %s656_s11 }
  0x77   :  { %v124_v8 = vpop.permute.xlu1 %123  ;;  %v96_v9 = vpop.permute.xlu0 %95 }
  0x78   :  { %v226_v10 = vsel %vm223_vm8, %v681_v0, %v96_v9 }
  0x7b   :  { %v138_v11 = vpop.permute.xlu1 %137  ;;  %v110_v12 = vpop.permute.xlu0 %109 }
  0x7c   :  { %v235_v13 = vsel %vm233_vm9, %v226_v10, %v110_v12 }
  0x7d   :  { %v242_v14 = vsel %vm240_vm10, %v235_v13, %v124_v8 }
  0x7e   :  { %v249_v17 = vsel %vm247_vm11, %v242_v14, %v138_v11 }
  0x7f   :  { %v158_v15 = vpop.permute.xlu1 %157  ;;  %v144_v16 = vpop.permute.xlu0 %143 }
  0x80   :  { %v256_v18 = vsel %vm254_vm12, %v249_v17, %v144_v16 }
  0x81   :  { %v263_v0 = vsel %vm261_vm13, %v256_v18, %v158_v15 }
  0x83   :  { %v180_v19 = vpop.permute.xlu1 %179  ;;  %v172_v20 = vpop.permute.xlu0 %171 }
  0x84   :  { %v270_v21 = vsel %vm268_vm14, %v263_v0, %v172_v20 }
  0x85   :  { %v277_v24 = vsel %vm275_vm15, %v270_v21, %v180_v19 }
  0x87   :  { %v202_v22 = vpop.permute.xlu1 %201  ;;  %v194_v23 = vpop.permute.xlu0 %193 }
  0x88   :  { %v284_v25 = vsel %vm282_vm0, %v277_v24, %v194_v23 }
  0x89   :  { %v291_v28 = vsel %vm289_vm1, %v284_v25, %v202_v22 }
  0x8b   :  { %v210_v26 = vpop.permute.xlu1 %209  ;;  %v98_v27 = vpop.permute.xlu0 %97 }
  0x8c   :  { %v298_v29 = vsel %vm296_vm3, %v291_v28, %v210_v26  ;;  %v229_v38 = vsel %vm223_vm8, %v686_v1, %v98_v27 }
  0x8f   :  { %v218_v30 = vpop.permute.xlu1 %217  ;;  %v112_v31 = vpop.permute.xlu0 %111 }
  0x90   :  { %v305_v33 = vsel %vm303_vm4, %v298_v29, %v218_v30  ;;  %v237_v41 = vsel %vm233_vm9, %v229_v38, %v112_v31 }
  0x91   :  { %577 = vmatmul.mubr.msk.bf16.vlgmr.msra.gmra.mxu0 %vm331_vm5, %v305_v33 }
  0x93   :  { %v140_v34 = vpop.permute.xlu1 %139  ;;  %v126_v35 = vpop.permute.xlu0 %125 }
  0x94   :  { %v244_v42 = vsel %vm240_vm10, %v237_v41, %v126_v35 }
  0x95   :  { %v251_v45 = vsel %vm247_vm11, %v244_v42, %v140_v34 }
  0x97   :  { %v160_v36 = vpop.permute.xlu1 %159  ;;  %v146_v37 = vpop.permute.xlu0 %145 }
  0x98   :  { %v258_v46 = vsel %vm254_vm12, %v251_v45, %v146_v37 }
  0x99   :  { %v265_v49 = vsel %vm261_vm13, %v258_v46, %v160_v36 }
  0x9b   :  { %v182_v39 = vpop.permute.xlu1 %181  ;;  %v174_v40 = vpop.permute.xlu0 %173 }
  0x9c   :  { %v272_v50 = vsel %vm268_vm14, %v265_v49, %v174_v40 }
  0x9d   :  { %v279_v52 = vsel %vm275_vm15, %v272_v50, %v182_v39 }
  0x9f   :  { %v196_v43 = vpop.permute.xlu1 %195  ;;  %v100_v44 = vpop.permute.xlu0 %99 }
  0xa0   :  { %v286_v53 = vsel %vm282_vm0, %v279_v52, %v196_v43  ;;  %v232_v58 = vsel %vm223_vm8, %v695_v6, %v100_v44 }
  0xa3   :  { %v204_v47 = vpop.permute.xlu1 %203  ;;  %v114_v48 = vpop.permute.xlu0 %113 }
  0xa4   :  { %v293_v54 = vsel %vm289_vm1, %v286_v53, %v204_v47  ;;  %v239_v60 = vsel %vm233_vm9, %v232_v58, %v114_v48 }
  0xa7   :  { %v212_v51 = vpop.permute.xlu1 %211  ;;  %v128_v1 = vpop.permute.xlu0 %127 }
  0xa8   :  { %v300_v55 = vsel %vm296_vm3, %v293_v54, %v212_v51  ;;  %v246_v61 = vsel %vm240_vm10, %v239_v60, %v128_v1 }
  0xab   :  { %v220_v56 = vpop.permute.xlu1 %219  ;;  %v142_v57 = vpop.permute.xlu0 %141 }
  0xac   :  { %v307_v59 = vsel %vm303_vm4, %v300_v55, %v220_v56  ;;  %v253_v62 = vsel %vm247_vm11, %v246_v61, %v142_v57 }
  0xad   :  { %581 = vmatmul.mubr.msk.bf16.vlgmr.msra.gmra.mxu1 %vm331_vm5, %v307_v59 }
  0xae   :  { %584 = vmatprep.mubr.msk.bf16.mxu1 %vm654_vm7, %v651_v32 }
  0xaf   :  { %v148_v63 = vpop.permute.xlu0 %147  ;;  %v162_v2 = vpop.permute.xlu1 %161 }
  0xb0   :  { %v260_v3 = vsel %vm254_vm12, %v253_v62, %v148_v63 }
  0xb1   :  { %v267_v4 = vsel %vm261_vm13, %v260_v3, %v162_v2 }
  0xb3   :  { %v176_v6 = vpop.permute.xlu0 %175  ;;  %v184_v5 = vpop.permute.xlu1 %183 }
  0xb4   :  { %v274_v7 = vsel %vm268_vm14, %v267_v4, %v176_v6 }
  0xb5   :  { %v281_v8 = vsel %vm275_vm15, %v274_v7, %v184_v5 }
  0xb7   :  { %v198_v9 = vpop.permute.xlu0 %197  ;;  %v206_v10 = vpop.permute.xlu1 %205 }
  0xb8   :  { %v288_v11 = vsel %vm282_vm0, %v281_v8, %v198_v9 }
  0xb9   :  { %v295_v32 = vsel %vm289_vm1, %v288_v11, %v206_v10 }
  0xbb   :  { %v214_v12 = vpop.permute.xlu0 %213  ;;  %v222_v13 = vpop.permute.xlu1 %221 }
  0xbc   :  { %v302_v14 = vsel %vm296_vm3, %v295_v32, %v214_v12 }
  0xbd   :  { %v309_v15 = vsel %vm303_vm4, %v302_v14, %v222_v13 }
  0xbe   :  { %585 = vmatmul.mubr.msk.bf16.gmra.mxu1 %vm331_vm5, %v309_v15 }
 0x151   :  { %v376_v16 = vpop.f32.mrf.mxu0 }
 0x152   :  { %v495_v18 = vmul.f32 %v376_v16, %v376_v16  ;;  %v478_v20 = vsel %vm261_vm13, %v376_v16, 0.0 }
 0x153   :  { %v578_v17 = vpop.f32.mrf.mxu0 }
 0x154   :  { %v501_v24 = vsel %vm261_vm13, %v495_v18, 0.0 }
 0x155   :  { %v379_v19 = vpop.f32.mrf.mxu0 }
 0x156   :  { %v479_v0 = vsel %vm261_vm13, %v379_v19, 0.0  ;;  %v496_v21 = vmul.f32 %v379_v19, %v379_v19 }
 0x157   :  { %v480_v22 = vadd.f32 %v479_v0, %v478_v20  ;;  %v579_v23 = vpop.f32.mrf.mxu0 }
 0x158   :  { %v502_v25 = vsel %vm261_vm13, %v496_v21, 0.0 }
 0x159   :  { %v489_v26 = vrot.slane %v480_v22, 4  ;;  %v503_v27 = vadd.f32 %v502_v25, %v501_v24 }
 0x15b   :  { %v490_v28 = vadd.f32 %v489_v26, %v480_v22  ;;  %v512_v29 = vrot.slane %v503_v27, 4 }
 0x15d   :  { %v491_v30 = vrot.slane %v490_v28, 2  ;;  %v513_v31 = vadd.f32 %v512_v29, %v503_v27 }
 0x15f   :  { %v492_v33 = vadd.f32 %v491_v30, %v490_v28  ;;  %v514_v34 = vrot.slane %v513_v31, 2 }
 0x161   :  { %v493_v35 = vrot.slane %v492_v33, 1  ;;  %v515_v36 = vadd.f32 %v514_v34, %v513_v31 }
 0x163   :  { %v516_v37 = vrot.slane %v515_v36, 1  ;;  %v494_v38 = vadd.f32 %v493_v35, %v492_v33 }
 0x165   :  { %v517_v39 = vadd.f32 %v516_v37, %v515_v36 }
 0x167   :  { %v519_v40 = vsel %vm129_vm2, %v494_v38, %v517_v39 }
 0x168   :  { %521 = vst.msk [vmem:[#allocation2] sm:$0x3] %vm520_vm6, %v519_v40 }
 0x169   :  { %632 = shalt.err (!%p629_p4)
}
 0x16a   :  { %531 = dma.vmem_to_hbm [thread:$0]  %s529_s15, 32, %s893_s3, [#allocation3]  }
 0x16d   :  { %v384_v41 = vpop.f32.mrf.mxu1 }
 0x16f   :  { %v582_v42 = vpop.f32.mrf.mxu1 }
 0x171   :  { %v387_v43 = vpop.f32.mrf.mxu1 }
 0x173   :  { %v583_v44 = vpop.f32.mrf.mxu1 }
 0x17e   :  { %v392_v45 = vpop.f32.mrf.mxu1 }
 0x180   :  { %v586_v46 = vpop.f32.mrf.mxu1 }
 0x182   :  { %v395_v47 = vpop.f32.mrf.mxu1 }
 0x184   :  { %v587_v48 = vpop.f32.mrf.mxu1 }
 0x185   :  { %641 = dma.done.wait [#allocation3], 32  }
 0x186   :  { %642 = vsyncadd [#allocation3], 4294967264 }
 0x187   :  { %535 = vsyncpa [#allocation3], 1 }

</bundles_post_ra>
